<compile_context>
chip_gen: v7x
topology: tpu7x:2x2x1
jax: 0.10.0
libtpu: 0.0.40
codegen_flags: <defaults>
</compile_context>

<pallas_src>
import functools
import math

import jax
import jax.numpy as jnp
from jax.experimental import pallas as pl
from jax.experimental.pallas import tpu as pltpu


def min_pool_trinary_ref(states):
    """Pure-JAX reference mirroring the PyTorch forward exactly."""
    length = states.shape[1]
    assert length >= 3
    side = (length + 1) // 3
    return jnp.concatenate(
        [
            jnp.min(states[:, :side], axis=1, keepdims=True),
            jnp.min(states[:, side : length - side], axis=1, keepdims=True),
            jnp.min(states[:, length - side :], axis=1, keepdims=True),
        ],
        axis=1,
    )


def _min_identity(dtype):
    dtype = jnp.dtype(dtype)
    if jnp.issubdtype(dtype, jnp.floating):
        return float("inf")
    if jnp.issubdtype(dtype, jnp.integer):
        return int(jnp.iinfo(dtype).max)
    raise NotImplementedError(f"unsupported dtype for min-pool: {dtype}")


def _pick_f_tile(F, itemsize, budget):
    """Pick the feature-tile width.

    Prefer the full F axis (one contiguous HBM run per row).  Only shrink when even
    8 rows of full-F would blow the per-block budget AND F is 128-divisible (a
    non-full tile must be a multiple of 128).  A non-dividing last f-block is fine:
    padded reads only affect padded lanes, padded writes are discarded.
    """
    if F % 128 != 0:
        return F  # only the full axis is a legal tile width
    if 8 * F * itemsize <= budget:
        return F
    max_f = (budget // (8 * itemsize * 128)) * 128
    return max(128, min(F, max_f))


def _minpool3_single_kernel(x_ref, o_ref, *, side, length):
    # x_ref: (1, length, f_tile); o_ref: (1, 3, f_tile).
    # side / length are static Python ints -> static row slices, no masks, no init.
    o_ref[0, 0:1, :] = jnp.min(x_ref[0, :side, :], axis=0, keepdims=True)
    o_ref[0, 1:2, :] = jnp.min(x_ref[0, side : length - side, :], axis=0,
                               keepdims=True)
    o_ref[0, 2:3, :] = jnp.min(x_ref[0, length - side :, :], axis=0, keepdims=True)


def _minpool3_chunked_kernel(x_ref, o_ref, *, side, length, chunk_rows, fill_value):
    # x_ref: (1, chunk_rows, f_tile) input tile.
    # o_ref: (1, 3, f_tile) output block, resident across the chunk (grid axis 2).
    c = pl.program_id(2)

    @pl.when(c == 0)
    def _init():
        o_ref[...] = jnp.full(o_ref.shape, fill_value, dtype=o_ref.dtype)

    x = x_ref[0]                                   # [chunk_rows, f_tile]
    row0 = c * chunk_rows
    row1 = row0 + chunk_rows

    in_seg0 = row1 <= side
    in_seg1 = jnp.logical_and(row0 >= side, row1 <= length - side)
    in_seg2 = jnp.logical_and(row0 >= length - side, row1 <= length)

    def _acc_row(k, m):
        o_ref[0, k : k + 1, :] = jnp.minimum(o_ref[0, k : k + 1, :], m)

    # Fast path: chunk lies entirely inside one segment -> single unmasked reduce.
    @pl.when(in_seg0)
    def _fast0():
        _acc_row(0, jnp.min(x, axis=0, keepdims=True))

    @pl.when(in_seg1)
    def _fast1():
        _acc_row(1, jnp.min(x, axis=0, keepdims=True))

    @pl.when(in_seg2)
    def _fast2():
        _acc_row(2, jnp.min(x, axis=0, keepdims=True))

    # Slow path: chunk straddles a segment boundary or is the partial tail.
    # The `valid` mask keeps Pallas-padded out-of-bounds rows out of the result.
    @pl.when(jnp.logical_not(in_seg0 | in_seg1 | in_seg2))
    def _slow():
        neutral = jnp.asarray(fill_value, dtype=x.dtype)
        rows = row0 + jax.lax.broadcasted_iota(jnp.int32, (chunk_rows, 1), 0)
        valid = rows < length
        seg0 = jnp.logical_and(valid, rows < side)
        seg1 = jnp.logical_and(valid,
                               jnp.logical_and(rows >= side, rows < length - side))
        seg2 = jnp.logical_and(valid, rows >= length - side)
        _acc_row(0, jnp.min(jnp.where(seg0, x, neutral), axis=0, keepdims=True))
        _acc_row(1, jnp.min(jnp.where(seg1, x, neutral), axis=0, keepdims=True))
        _acc_row(2, jnp.min(jnp.where(seg2, x, neutral), axis=0, keepdims=True))


def min_pool_trinary(states, *, max_rows_per_chunk=1024,
                     tile_budget_bytes=4 * 1024 * 1024,
                     min_pallas_bytes=1 << 20):
    """Pallas implementation of MinPoolTrinary.forward.

    states: [batch, length, *trailing]  ->  [batch, 3, *trailing]
    """
    assert states.ndim >= 2
    batch, length = int(states.shape[0]), int(states.shape[1])
    assert length >= 3, "MinPoolTrinary requires length >= 3"
    trailing = tuple(int(d) for d in states.shape[2:])
    F = math.prod(trailing) if trailing else 1
    itemsize = jnp.dtype(states.dtype).itemsize
    side = (length + 1) // 3

    # Tiny or lane-starved inputs: launch + pipeline prologue dominates; let XLA
    # fuse the slices + min instead.
    if states.size * itemsize < min_pallas_bytes or F < 128:
        return min_pool_trinary_ref(states)

    x = states.reshape(batch, length, F)

    f_tile = _pick_f_tile(F, itemsize, tile_budget_bytes)
    # Megacore (v7x): make sure there is >= 2 units of parallel grid work when
    # batch == 1 by splitting the feature axis in two (still 128-multiple tiles).
    if batch == 1 and f_tile == F and F % 256 == 0 and F >= 1024:
        f_tile = F // 2
    n_f = pl.cdiv(F, f_tile)

    fill_value = _min_identity(states.dtype)
    cost = pl.CostEstimate(
        flops=int(2 * batch * length * F),
        transcendentals=0,
        bytes_accessed=int((batch * length * F + batch * 3 * F) * itemsize),
    )

    rows_fit = max(1, tile_budget_bytes // (f_tile * itemsize))

    if length <= max_rows_per_chunk and length <= rows_fit:
        # ---- single-chunk specialization: static slices, no masks, no accumulate.
        in_block_bytes = length * f_tile * itemsize
        vmem_limit = int(min(64 << 20,
                             max(16 << 20,
                                 2 * (in_block_bytes + 8 * f_tile * itemsize)
                                 + (4 << 20))))
        kernel = functools.partial(_minpool3_single_kernel, side=side, length=length)
        out = pl.pallas_call(
            kernel,
            out_shape=jax.ShapeDtypeStruct((batch, 3, F), states.dtype),
            grid=(batch, n_f),
            in_specs=[pl.BlockSpec((1, length, f_tile), lambda b, f: (b, 0, f))],
            out_specs=pl.BlockSpec((1, 3, f_tile), lambda b, f: (b, 0, f)),
            compiler_params=pltpu.CompilerParams(
                dimension_semantics=("parallel", "parallel"),
                vmem_limit_bytes=vmem_limit,
            ),
            cost_estimate=cost,
        )(x)
    else:
        # ---- multi-chunk path: resident 3-row accumulator, chunk axis last.
        chunk_rows = max(8, min(max_rows_per_chunk, (rows_fit // 8) * 8))
        n_chunks = pl.cdiv(length, chunk_rows)
        in_block_bytes = chunk_rows * f_tile * itemsize
        vmem_limit = int(min(64 << 20,
                             max(16 << 20,
                                 2 * (in_block_bytes + 8 * f_tile * itemsize)
                                 + (4 << 20))))
        kernel = functools.partial(
            _minpool3_chunked_kernel,
            side=side,
            length=length,
            chunk_rows=chunk_rows,
            fill_value=fill_value,
        )
        out = pl.pallas_call(
            kernel,
            out_shape=jax.ShapeDtypeStruct((batch, 3, F), states.dtype),
            grid=(batch, n_f, n_chunks),
            in_specs=[pl.BlockSpec((1, chunk_rows, f_tile),
                                   lambda b, f, c: (b, c, f))],
            out_specs=pl.BlockSpec((1, 3, f_tile), lambda b, f, c: (b, 0, f)),
            compiler_params=pltpu.CompilerParams(
                dimension_semantics=("parallel", "parallel", "arbitrary"),
                vmem_limit_bytes=vmem_limit,
            ),
            cost_estimate=cost,
        )(x)

    return out.reshape((batch, 3) + trailing)


if __name__ == "__main__":
    key = jax.random.PRNGKey(0)

    test_cases = [
        # (shape, dtype)
        ((2, 10, 4, 8), jnp.float32),       # tiny -> plain-JAX fallback path
        ((2, 9), jnp.float32),              # 2-D input (no trailing dims), fallback
        ((3, 131, 8, 96), jnp.float32),     # Pallas single-chunk, odd length, F=768
        ((1, 1024, 4, 256), jnp.float32),   # Pallas single-chunk, batch=1 -> f split
        ((2, 6200, 2, 128), jnp.float32),   # Pallas multi-chunk: fast + slow + tail
        ((4, 520, 8, 64), jnp.bfloat16),    # Pallas single-chunk, bf16
        ((2, 2600, 256), jnp.bfloat16),     # Pallas multi-chunk, bf16, boundary chunks
    ]

    for i, (shape, dtype) in enumerate(test_cases):
        key, sub = jax.random.split(key)
        xin = jax.random.normal(sub, shape, jnp.float32).astype(dtype)

        out = jax.block_until_ready(min_pool_trinary(xin))
        ref = jax.block_until_ready(min_pool_trinary_ref(xin))

        assert out.shape == ref.shape, (i, out.shape, ref.shape)
        assert bool(jnp.all(out == ref)), \
            f"mismatch for case {i}: shape={shape} dtype={dtype}"

    print("KERNEL_OK")
</pallas_src>

<mosaic_0001>
module attributes {stable_mosaic.version = 11 : i64} {
  func.func @_minpool3_single_kernel(%arg0: i32, %arg1: i32, %arg2: memref<1x131x768xf32, #tpu.memory_space<vmem>>, %arg3: memref<1x3x768xf32, #tpu.memory_space<vmem>>) attributes {dimension_semantics = [#tpu.dimension_semantics<parallel>, #tpu.dimension_semantics<parallel>], iteration_bounds = array<i64: 3, 1>, scalar_prefetch = 0 : i64, scratch_operands = 0 : i64, tpu.core_type = #tpu.core_type<tc>, window_params = [{transform_indices = @transform_0, window_bounds = array<i64: 1, 131, 768>}, {transform_indices = @transform_1, window_bounds = array<i64: 1, 3, 768>}]} {
    %c0 = arith.constant 0 : index
    %c0_0 = arith.constant 0 : index
    %c0_1 = arith.constant 0 : index
    %0 = vector.load %arg2[%c0, %c0_0, %c0_1] : memref<1x131x768xf32, #tpu.memory_space<vmem>>, vector<1x44x768xf32>
    %1 = vector.shape_cast %0 : vector<1x44x768xf32> to vector<44x768xf32>
    %cst = arith.constant dense<0x7F800000> : vector<768xf32>
    %2 = vector.multi_reduction <minimumf>, %1, %cst [0] : vector<44x768xf32> to vector<768xf32>
    %3 = vector.shape_cast %2 : vector<768xf32> to vector<1x768xf32>
    %c0_2 = arith.constant 0 : index
    %c0_3 = arith.constant 0 : index
    %c0_4 = arith.constant 0 : index
    %4 = vector.load %arg3[%c0_2, %c0_3, %c0_4] : memref<1x3x768xf32, #tpu.memory_space<vmem>>, vector<1x1x768xf32>
    %5 = vector.shape_cast %4 : vector<1x1x768xf32> to vector<1x768xf32>
    %6 = vector.shape_cast %3 : vector<1x768xf32> to vector<1x1x768xf32>
    tpu.vector_store %arg3[%c0_2, %c0_3, %c0_4], %6 {strides = array<i32>} : memref<1x3x768xf32, #tpu.memory_space<vmem>>, vector<1x1x768xf32>,
    %c0_5 = arith.constant 0 : index
    %c44 = arith.constant 44 : index
    %c0_6 = arith.constant 0 : index
    %7 = vector.load %arg2[%c0_5, %c44, %c0_6] : memref<1x131x768xf32, #tpu.memory_space<vmem>>, vector<1x43x768xf32>
    %8 = vector.shape_cast %7 : vector<1x43x768xf32> to vector<43x768xf32>
    %cst_7 = arith.constant dense<0x7F800000> : vector<768xf32>
    %9 = vector.multi_reduction <minimumf>, %8, %cst_7 [0] : vector<43x768xf32> to vector<768xf32>
    %10 = vector.shape_cast %9 : vector<768xf32> to vector<1x768xf32>
    %c0_8 = arith.constant 0 : index
    %c1 = arith.constant 1 : index
    %c0_9 = arith.constant 0 : index
    %11 = vector.load %arg3[%c0_8, %c1, %c0_9] : memref<1x3x768xf32, #tpu.memory_space<vmem>>, vector<1x1x768xf32>
    %12 = vector.shape_cast %11 : vector<1x1x768xf32> to vector<1x768xf32>
    %13 = vector.shape_cast %10 : vector<1x768xf32> to vector<1x1x768xf32>
    tpu.vector_store %arg3[%c0_8, %c1, %c0_9], %13 {strides = array<i32>} : memref<1x3x768xf32, #tpu.memory_space<vmem>>, vector<1x1x768xf32>,
    %c0_10 = arith.constant 0 : index
    %c87 = arith.constant 87 : index
    %c0_11 = arith.constant 0 : index
    %14 = vector.load %arg2[%c0_10, %c87, %c0_11] : memref<1x131x768xf32, #tpu.memory_space<vmem>>, vector<1x44x768xf32>
    %15 = vector.shape_cast %14 : vector<1x44x768xf32> to vector<44x768xf32>
    %cst_12 = arith.constant dense<0x7F800000> : vector<768xf32>
    %16 = vector.multi_reduction <minimumf>, %15, %cst_12 [0] : vector<44x768xf32> to vector<768xf32>
    %17 = vector.shape_cast %16 : vector<768xf32> to vector<1x768xf32>
    %c0_13 = arith.constant 0 : index
    %c2 = arith.constant 2 : index
    %c0_14 = arith.constant 0 : index
    %18 = vector.load %arg3[%c0_13, %c2, %c0_14] : memref<1x3x768xf32, #tpu.memory_space<vmem>>, vector<1x1x768xf32>
    %19 = vector.shape_cast %18 : vector<1x1x768xf32> to vector<1x768xf32>
    %20 = vector.shape_cast %17 : vector<1x768xf32> to vector<1x1x768xf32>
    tpu.vector_store %arg3[%c0_13, %c2, %c0_14], %20 {strides = array<i32>} : memref<1x3x768xf32, #tpu.memory_space<vmem>>, vector<1x1x768xf32>,
    return
  }
  func.func @transform_0(%arg0: i32, %arg1: i32) -> (i32, i32, i32) {
    %c0_i32 = arith.constant 0 : i32
    %c0_i32_0 = arith.constant 0 : i32
    return %arg0, %c0_i32, %arg1 : i32, i32, i32
  }
  func.func @transform_1(%arg0: i32, %arg1: i32) -> (i32, i32, i32) {
    %c0_i32 = arith.constant 0 : i32
    %c0_i32_0 = arith.constant 0 : i32
    return %arg0, %c0_i32, %arg1 : i32, i32, i32
  }
}

</mosaic_0001>

<bundles_post_ra>
// kernel: tpu_custom_call.1
= control target key start
LH: loop header
LB: loop body
LE: loop exit
PB: predicated region body
PF: predicated region fallthrough
CT: control target
= control target key end

     0   :  { %6 = vsyncpa [#allocation3], 0  ;;  %s1327_s0 = inlined_call_operand.hbm [shape: f32[3,131,768], index: 0, kind: input, shape index: {}]   ;;  %s1328_s1 = inlined_call_operand.hbm [shape: f32[3,3,768], index: 1, kind: output, shape index: {}]  }
   0x1   :  { %8 = vsyncpa [#allocation3 + $0x1], 0 }
   0x2   :  { %9 = vsyncpa [#allocation4], 0 }
   0x3   :  { %11 = vsyncpa [#allocation4 + $0x1], 0  ;;  %s969_s6 = smov 0   ;;  %s971_s7 = smov 0  }
   0x4   :  { %s973_s8 = smov 0   ;;  %s975_s9 = smov 0  }
   0x5   :  { %s977_s10 = smov 0   ;;  %s979_s11 = smov 0  }
   0x6 LB: > { %s759_s12 = sadd.s32 4294967295, %s952_s11   ;;  %s760_s13 = sadd.s32 4294967294, %s952_s11   ;;  %s952_s11 = sphi %s979_s11, %s17_s11   ;;  %s948_s10 = sphi %s977_s10, %s1344_s10   ;;  %s944_s9 = sphi %s975_s9, %s1343_s9   ;;  %s940_s8 = sphi %s973_s8, %s1342_s8   ;;  %s936_s7 = sphi %s971_s7, %s1341_s7   ;;  %s932_s6 = sphi %s969_s6, %s1340_s6  }
   0x7   : > { %s29_s14 = sadd.s32 1, %s948_s10  ;;  %s38_s15 = sadd.s32 1, %s940_s8 }
   0x8   : > { %p31_p0 = scmp.ge.s32.totalorder %s29_s14, 3  ;;  %p45_p1 = scmp.ne.s32.totalorder %s940_s8, %s936_s7 }
   0x9   : > { %p46_p2 = scmp.eq.s32.totalorder %s952_s11, 0  ;;  %p51_p3 = scmp.ne.s32.totalorder %s936_s7, %s932_s6 }
   0xa   : > { %s1346_s14 = smov (%p31_p0, %s29_s14), 0  ;;  %p52_p5 = scmp.eq.s32.totalorder %s759_s12, 0 }
   0xb   : > { %p1010_p4 = por %p46_p2, %p45_p1  ;;  %s33_s17 = ssub.s32 %s948_s10, %s1346_s14 }
   0xc   : > { %p77_p6 = scmp.eq.s32.totalorder %s759_s12, 2  ;;  %p36_p7 = scmp.eq.s32.totalorder %s33_s17, 0 }
   0xd   : > { %p1016_p8 = por %p52_p5, %p51_p3  ;;  %p83_p10 = scmp.eq.s32.totalorder %s760_s13, 2 }
   0xe   : > { %p1020_p9 = por %p77_p6, %p45_p1  ;;  %p787_p12 = scmp.lt.s32.totalorder %s952_s11, 3 }
   0xf   : > { %s1025_s20 = scalar_select %p36_p7, %s940_s8, %s38_s15  }
  0x10   : > { %s1332_s19 = scalar_select %p1020_p9, 1, 0 }
  0x11   : > { %p1027_p11 = por %p83_p10, %p51_p3  ;;  %s103_s22 = sand.u32 1, %s940_s8  }
  0x12   : > { %s770_s23 = smul.u32 816, %s103_s22  ;;  %p1036_p13 = pnand %p787_p12, %p1010_p4 }
  0x13   : > { %s1333_s21 = scalar_select %p1027_p11, 1, 0 }
  0x14   : > { %s771_s24 = smul.u32 13056, %s948_s10  ;;  %s107_s29 = scalar_lea.vmem [#allocation2], %s770_s23 }
  0x15   : > { %s116_s30 = sshll.u32 %s107_s29, 4  ;;  %s1048_s2 = scalar_lea.sflag [#allocation3], %s103_s22  ;;  %s1045_s30 = int_to_ptr.vmem [resolvable:$true] %s116_s30 }
  0x16   : > { %s1043_s28 = scalar_lea.hbm %s1327_s0, %s771_s24  ;;  %p842_p2 = pneg %p1036_p13 }
  0x17   : > { %s840_s3 = scalar_lea.hbm %s1043_s28, 13056  ;;  %s845_s12 = scalar_lea.hbm %s1327_s0, 39168 }
  0x18   : > { %p841_p1 = scmp.ne.s32.totalorder %s1043_s28, %s840_s3  ;;  %p846_p5 = scmp.lt.u32.totalorder %s1043_s28, %s1327_s0 }
  0x19   : > { %p847_p6 = scmp.lt.u32.totalorder %s845_s12, %s840_s3  ;;  %p849_p10 = scmp.lt.u32.totalorder %s840_s3, %s1043_s28 }
  0x1a   : > { %p843_p3 = pnand %p842_p2, %p841_p1 }
  0x1b   : > { %p848_p7 = por %p847_p6, %p846_p5 }
  0x1c   : > { %p844_p4 = pneg %p843_p3 }
  0x1d   : > { %p850_p12 = por %p849_p10, %p848_p7 }
  0x1f   : > { %p851_p0 = pnand %p850_p12, %p844_p4 }
  0x21   : > { %854 = shalt.err (!%p851_p0)
}
  0x22   : > { %s855_s16 = scalar_lea.vmem %s1045_s30, 13056  ;;  %s954_s17 = smov [#allocation2]  }
  0x23   : > { %p856_p1 = scmp.ne.s32.totalorder %s1045_s30, %s855_s16  ;;  %s860_s22 = sshll.u32 %s954_s17, 4  ;;  %s861_s22 = int_to_ptr.vmem [resolvable:$false] %s860_s22 }
  0x24   : > { %s862_s23 = scalar_lea.vmem %s861_s22, 26112  ;;  %p863_p9 = scmp.lt.s32.totalorder %s1045_s30, %s861_s22 }
  0x25   : > { %p858_p3 = pnand %p856_p1, %p842_p2  ;;  %p864_p5 = scmp.lt.s32.totalorder %s862_s23, %s855_s16 }
  0x27   : > { %p859_p11 = pneg %p858_p3  ;;  %p865_p6 = por %p864_p5, %p863_p9 }
  0x29   : > { %p866_p7 = pnand %p865_p6, %p859_p11 }
  0x2b   : > { %869 = shalt.err (!%p866_p7)
}
  0x2c   : > { %s955_s24 = smov 768   ;;  %s956_s26 = smov 48  }
  0x2d   : > { %782 = dma.hbm_to_vmem [thread:$0]  (!%p1036_p13), %s1043_s28, 13056, %s1045_s30, %s1048_s2, %s955_s24, %s955_s24, %s956_s26  }
  0x2e   : > { %p124_p0 = scmp.lt.s32.totalorder %s952_s11, 4  ;;  %p1335_p2 = scmp.ge.s32.totalorder %s952_s11, 1 }
  0x30   : > { %p125_p4 = pnand %p1335_p2, %p124_p0 }
  0x31   : > { %s1080_s27 = sand.u32 (!%p125_p4), 1, %s936_s7  }
  0x32   : > { %128 = sbr.rel (%p125_p4) target bundleno = 162 (0xa2), region = 24  ;;  %s131_s3 = scalar_lea.sflag (!%p125_p4), [#allocation3], %s1080_s27 }
  0x33   : > { %s772_s29 = smul.u32 (!%p125_p4), 816, %s1080_s27 }
  0x35   : > { %s1084_s4 = scalar_lea.vmem (!%p125_p4), [#allocation2], %s772_s29 }
  0x39   : > { %923 = dma.done.wait (%p1016_p8), %s131_s3, 13056  }
  0x3a   : > { %925 = vsyncadd (%p1016_p8), %s131_s3, 4294954240  ;;  %v155_v0 = vld [vmem:[%s1084_s4] sm:$0xff]  ;;  %v156_v1 = vld [vmem:[%s1084_s4 + $0x8] sm:$0xff]  ;;  %v276_v27 = vlaneseq  ;;  %v957_v34 = vmov 1966171168   ;;  %vm195_vm0 = vcmask 1043456  }
  0x3b   : > { %v157_v2 = vld [vmem:[%s1084_s4 + $0x10] sm:$0xff]  ;;  %v158_v3 = vld [vmem:[%s1084_s4 + $0x18] sm:$0xff]  ;;  %v159_v4 = vld [vmem:[%s1084_s4 + $0x20] sm:$0xff]  ;;  %v274_v35 = vunpack.c.l.s4 %v957_v34  ;;  %vm352_vm1 = vcmask 1047556   ;;  %vm358_vm2 = vcmask 1046528   ;;  %vm523_vm3 = vcmask 1047559  }
  0x3c   : > { %v160_v5 = vld [vmem:[%s1084_s4 + $0x28] sm:$0xff]  ;;  %v161_v6 = vld [vmem:[%s1084_s4 + $0x30] sm:$0xff]  ;;  %v162_v7 = vld [vmem:[%s1084_s4 + $0x38] sm:$0xff]  ;;  %v277_v54 = vshrl.u32 %v276_v27, 7  ;;  %vm1156_vm4 = vcmp.lt.s32.totalorder %v276_v27, 768  ;;  %vm530_vm5 = vcmask 1042432  }
  0x3d   : > { %v163_v8 = vld [vmem:[%s1084_s4 + $0x40] sm:$0xff]  ;;  %v164_v9 = vld [vmem:[%s1084_s4 + $0x48] sm:$0xff]  ;;  %v165_v10 = vld [vmem:[%s1084_s4 + $0x50] sm:$0xff]  ;;  %v191_v12 = vmin.f32 %v155_v0, %v161_v6  ;;  %v204_v13 = vmin.f32 %v156_v1, %v162_v7  ;;  %v275_v59 = vunpack.c.0.s8 %v274_v35  ;;  %s773_s18 = smul.u32 24, %s1080_s27  ;;  %s659_s13 = scalar_lea.sflag [#allocation4], %s1080_s27 }
  0x3e   : > { %v166_v11 = vld [vmem:[%s1084_s4 + $0x58] sm:$0xff]  ;;  %v216_v14 = vmin.f32 %v157_v2, %v163_v8  ;;  %v167_v15 = vld [vmem:[%s1084_s4 + $0x60] sm:$0xff]  ;;  %v168_v16 = vld [vmem:[%s1084_s4 + $0x68] sm:$0xff]  ;;  %v228_v18 = vmin.f32 %v158_v3, %v164_v9  ;;  %v240_v19 = vmin.f32 %v159_v4, %v165_v10  ;;  %s774_s28 = smul.u32 384, %s944_s9  ;;  %p1338_p9 = scmp.ne.s32.totalorder %s1332_s19, 0 }
  0x3f   : > { %v169_v17 = vld [vmem:[%s1084_s4 + $0x70] sm:$0xff]  ;;  %v252_v20 = vmin.f32 %v160_v5, %v166_v11  ;;  %v170_v21 = vld [vmem:[%s1084_s4 + $0x78] sm:$0xff]  ;;  %v171_v22 = vld [vmem:[%s1084_s4 + $0x80] sm:$0xff]  ;;  %v192_v24 = vmin.f32 %v191_v12, %v167_v15  ;;  %v205_v25 = vmin.f32 %v204_v13, %v168_v16  ;;  %v1135_v13 = vsub.s32 %v275_v59, %v277_v54  ;;  %s1197_s25 = scalar_lea.vmem [#allocation5], %s773_s18  ;;  %s958_s9 = smov [#allocation5]  }
  0x40   : > { %v172_v23 = vld [vmem:[%s1084_s4 + $0x88] sm:$0xff]  ;;  %v217_v26 = vmin.f32 %v216_v14, %v169_v17  ;;  %v173_v28 = vld [vmem:[%s1084_s4 + $0x90] sm:$0xff]  ;;  %v174_v29 = vld [vmem:[%s1084_s4 + $0x98] sm:$0xff]  ;;  %v229_v31 = vmin.f32 %v228_v18, %v170_v21  ;;  %v241_v32 = vmin.f32 %v240_v19, %v171_v22  ;;  %s675_s30 = sshll.u32 %s1197_s25, 4  ;;  %s1276_s12 = scalar_lea.hbm %s1328_s1, %s774_s28  ;;  %s1278_s30 = int_to_ptr.vmem [resolvable:$true] %s675_s30 }
  0x41   : > { %v175_v30 = vld [vmem:[%s1084_s4 + $0xa0] sm:$0xff]  ;;  %v253_v33 = vmin.f32 %v252_v20, %v172_v23  ;;  %v176_v36 = vld [vmem:[%s1084_s4 + $0xa8] sm:$0xff]  ;;  %v177_v37 = vld [vmem:[%s1084_s4 + $0xb0] sm:$0xff]  ;;  %v193_v39 = vmin.f32 %v192_v24, %v173_v28  ;;  %v206_v40 = vmin.f32 %v205_v25, %v174_v29  ;;  %s870_s15 = scalar_lea.vmem %s1278_s30, 384  ;;  %s874_s16 = sshll.u32 %s958_s9, 4  ;;  %s875_s16 = int_to_ptr.vmem [resolvable:$false] %s874_s16 }
  0x42   : > { %v178_v38 = vld [vmem:[%s1084_s4 + $0xb8] sm:$0xff]  ;;  %v218_v41 = vmin.f32 %v217_v26, %v175_v30  ;;  %v179_v42 = vld [vmem:[%s1084_s4 + $0xc0] sm:$0xff]  ;;  %v180_v43 = vld [vmem:[%s1084_s4 + $0xc8] sm:$0xff]  ;;  %v230_v45 = vmin.f32 %v229_v31, %v176_v36  ;;  %v242_v46 = vmin.f32 %v241_v32, %v177_v37  ;;  %p871_p8 = scmp.ne.s32.totalorder %s1278_s30, %s870_s15  ;;  %s876_s17 = scalar_lea.vmem %s875_s16, 768 }
  0x43   : > { %v181_v44 = vld [vmem:[%s1084_s4 + $0xd0] sm:$0xff]  ;;  %v254_v47 = vmin.f32 %v253_v33, %v178_v38  ;;  %v182_v48 = vld [vmem:[%s1084_s4 + $0xd8] sm:$0xff]  ;;  %v183_v49 = vld [vmem:[%s1084_s4 + $0xe0] sm:$0xff]  ;;  %v194_v51 = vmin.f32 %v193_v39, %v179_v42  ;;  %v207_v52 = vmin.f32 %v206_v40, %v180_v43  ;;  %p877_p10 = scmp.lt.s32.totalorder %s1278_s30, %s875_s16  ;;  %p878_p12 = scmp.lt.s32.totalorder %s876_s17, %s870_s15 }
  0x44   : > { %v184_v50 = vld [vmem:[%s1084_s4 + $0xe8] sm:$0xff]  ;;  %v219_v53 = vmin.f32 %v218_v41, %v181_v44  ;;  %v185_v55 = vld [vmem:[%s1084_s4 + $0xf0] sm:$0xf]  ;;  %v186_v56 = vld [vmem:[%s1084_s4 + $0xf8] sm:$0xf]  ;;  %v231_v58 = vmin.f32 %v230_v45, %v182_v48  ;;  %v243_v63 = vmin.f32 %v242_v46, %v183_v49  ;;  %p872_p11 = pnand %p871_p8, %p1338_p9 }
  0x45   : > { %v187_v57 = vld [vmem:[%s1084_s4 + $0x100] sm:$0xf]  ;;  %v188_v60 = vld [vmem:[%s1084_s4 + $0x108] sm:$0xf]  ;;  %v189_v61 = vld [vmem:[%s1084_s4 + $0x110] sm:$0xf]  ;;  %v255_v0 = vmin.f32 %v254_v47, %v184_v50  ;;  %p879_p1 = por %p878_p12, %p877_p10 }
  0x46   : > { %v190_v62 = vld [vmem:[%s1084_s4 + $0x118] sm:$0xf]  ;;  %v196_v1 = vsel %vm195_vm0, %v185_v55, inf  ;;  %v208_v2 = vsel %vm195_vm0, %v186_v56, inf  ;;  %v220_v3 = vsel %vm195_vm0, %v187_v57, inf  ;;  %v232_v4 = vsel %vm195_vm0, %v188_v60, inf  ;;  %p873_p13 = pneg %p872_p11 }
  0x47   : > { %v197_v5 = vmin.f32 %v194_v51, %v196_v1  ;;  %v209_v6 = vmin.f32 %v207_v52, %v208_v2  ;;  %v221_v7 = vmin.f32 %v219_v53, %v220_v3  ;;  %v233_v8 = vmin.f32 %v231_v58, %v232_v4  ;;  %v316_v9 = vld [vmem:[%s1084_s4 + $0xf0] sm:$0xf0]  ;;  %v317_v10 = vld [vmem:[%s1084_s4 + $0xf8] sm:$0xf0]  ;;  %v322_v18 = vld [vmem:[%s1084_s4 + $0x120] sm:$0xff] }
  0x48   : > { %v244_v11 = vsel %vm195_vm0, %v189_v61, inf  ;;  %v256_v12 = vsel %vm195_vm0, %v190_v62, inf  ;;  %v323_v19 = vld [vmem:[%s1084_s4 + $0x128] sm:$0xff]  ;;  %v353_v22 = vsel %vm352_vm1, %v316_v9, inf  ;;  %v367_v23 = vsel %vm352_vm1, %v317_v10, inf  ;;  %v328_v29 = vld [vmem:[%s1084_s4 + $0x150] sm:$0xff]  ;;  %p880_p3 = pnand %p879_p1, %p873_p13 }
  0x49   : > { %v198_v14 = vrot.slane %v197_v5, 4  ;;  %v210_v15 = vrot.slane %v209_v6, 4  ;;  %v222_v16 = vrot.slane %v221_v7, 4  ;;  %v234_v17 = vrot.slane %v233_v8, 4  ;;  %v329_v30 = vld [vmem:[%s1084_s4 + $0x158] sm:$0xff]  ;;  %v334_v39 = vld [vmem:[%s1084_s4 + $0x180] sm:$0xff] }
  0x4a   : > { %v245_v20 = vmin.f32 %v243_v63, %v244_v11  ;;  %v257_v21 = vmin.f32 %v255_v0, %v256_v12  ;;  %v354_v33 = vmin.f32 %v353_v22, %v322_v18  ;;  %v368_v34 = vmin.f32 %v367_v23, %v323_v19  ;;  %v335_v42 = vld [vmem:[%s1084_s4 + $0x188] sm:$0xff]  ;;  %v340_v49 = vld [vmem:[%s1084_s4 + $0x1b0] sm:$0xff]  ;;  %v341_v52 = vld [vmem:[%s1084_s4 + $0x1b8] sm:$0xff] }
  0x4b   : > { %v199_v24 = vmin.f32 %v197_v5, %v198_v14  ;;  %v211_v25 = vmin.f32 %v209_v6, %v210_v15  ;;  %v223_v26 = vmin.f32 %v221_v7, %v222_v16  ;;  %v235_v28 = vmin.f32 %v233_v8, %v234_v17  ;;  %v346_v61 = vld [vmem:[%s1084_s4 + $0x1e0] sm:$0x7f]  ;;  %v347_v62 = vld [vmem:[%s1084_s4 + $0x1e8] sm:$0x7f]  ;;  %v324_v14 = vld [vmem:[%s1084_s4 + $0x130] sm:$0xff] }
  0x4c   : > { %v246_v31 = vrot.slane %v245_v20, 4  ;;  %v258_v32 = vrot.slane %v257_v21, 4  ;;  %v355_v43 = vmin.f32 %v354_v33, %v328_v29  ;;  %v369_v44 = vmin.f32 %v368_v34, %v329_v30  ;;  %v318_v5 = vld [vmem:[%s1084_s4 + $0x100] sm:$0xf0]  ;;  %v319_v12 = vld [vmem:[%s1084_s4 + $0x108] sm:$0xf0] }
  0x4d   : > { %v200_v35 = vrot.slane %v199_v24, 2  ;;  %v212_v36 = vrot.slane %v211_v25, 2  ;;  %v224_v37 = vrot.slane %v223_v26, 2  ;;  %v236_v38 = vrot.slane %v235_v28, 2  ;;  %v348_v15 = vld [vmem:[%s1084_s4 + $0x1f0] sm:$0x7f] }
  0x4e   : > { %v247_v40 = vmin.f32 %v245_v20, %v246_v31  ;;  %v259_v41 = vmin.f32 %v257_v21, %v258_v32  ;;  %v356_v53 = vmin.f32 %v355_v43, %v334_v39  ;;  %v370_v54 = vmin.f32 %v369_v44, %v335_v42  ;;  %v320_v21 = vld [vmem:[%s1084_s4 + $0x110] sm:$0xf0]  ;;  %v325_v22 = vld [vmem:[%s1084_s4 + $0x138] sm:$0xff]  ;;  %v331_v31 = vld [vmem:[%s1084_s4 + $0x168] sm:$0xff] }
  0x4f   : > { %v201_v45 = vmin.f32 %v199_v24, %v200_v35  ;;  %v213_v46 = vmin.f32 %v211_v25, %v212_v36  ;;  %v225_v47 = vmin.f32 %v223_v26, %v224_v37  ;;  %v237_v48 = vmin.f32 %v235_v28, %v236_v38  ;;  %v330_v26 = vld [vmem:[%s1084_s4 + $0x160] sm:$0xff]  ;;  %v349_v28 = vld [vmem:[%s1084_s4 + $0x1f8] sm:$0x7f]  ;;  %v336_v38 = vld [vmem:[%s1084_s4 + $0x190] sm:$0xff] }
  0x50   : > { %v248_v50 = vrot.slane %v247_v40, 2  ;;  %v260_v51 = vrot.slane %v259_v41, 2  ;;  %v357_v63 = vmin.f32 %v356_v53, %v340_v49  ;;  %v371_v0 = vmin.f32 %v370_v54, %v341_v52  ;;  %v321_v36 = vld [vmem:[%s1084_s4 + $0x118] sm:$0xf0]  ;;  %v326_v37 = vld [vmem:[%s1084_s4 + $0x140] sm:$0xff]  ;;  %v327_v43 = vld [vmem:[%s1084_s4 + $0x148] sm:$0xff] }
  0x51   : > { %v202_v55 = vrot.slane %v201_v45, 1  ;;  %v214_v56 = vrot.slane %v213_v46, 1  ;;  %v226_v57 = vrot.slane %v225_v47, 1  ;;  %v238_v58 = vrot.slane %v237_v48, 1  ;;  %v337_v44 = vld [vmem:[%s1084_s4 + $0x198] sm:$0xff]  ;;  %v332_v49 = vld [vmem:[%s1084_s4 + $0x170] sm:$0xff] }
  0x52   : > { %v249_v59 = vmin.f32 %v247_v40, %v248_v50  ;;  %v261_v60 = vmin.f32 %v259_v41, %v260_v51  ;;  %v359_v8 = vsel %vm358_vm2, %v346_v61, inf  ;;  %v372_v9 = vsel %vm358_vm2, %v347_v62, inf  ;;  %v342_v50 = vld [vmem:[%s1084_s4 + $0x1c0] sm:$0xff] }
  0x53   : > { %v203_v1 = vmin.f32 %v201_v45, %v202_v55  ;;  %v215_v2 = vmin.f32 %v213_v46, %v214_v56  ;;  %v227_v3 = vmin.f32 %v225_v47, %v226_v57  ;;  %v239_v4 = vmin.f32 %v237_v48, %v238_v58  ;;  %v350_v51 = vld [vmem:[%s1084_s4 + $0x200] sm:$0x7f]  ;;  %v333_v56 = vld [vmem:[%s1084_s4 + $0x178] sm:$0xff]  ;;  %v343_v57 = vld [vmem:[%s1084_s4 + $0x1c8] sm:$0xff] }
  0x54   : > { %v250_v6 = vrot.slane %v249_v59, 1  ;;  %v262_v7 = vrot.slane %v261_v60, 1  ;;  %v360_v16 = vmin.f32 %v357_v63, %v359_v8  ;;  %v373_v17 = vmin.f32 %v371_v0, %v372_v9  ;;  %v338_v61 = vld [vmem:[%s1084_s4 + $0x1a0] sm:$0xff]  ;;  %v344_v9 = vld [vmem:[%s1084_s4 + $0x1d0] sm:$0xff] }
  0x55   : > { %v270_v10 = vcombine.low %v203_v1, %v215_v2  ;;  %v271_v11 = vcombine.low %v227_v3, %v239_v4  ;;  %v380_v23 = vsel %vm352_vm1, %v318_v5, inf  ;;  %v385_v33 = vsel %vm358_vm2, %v348_v15, inf  ;;  %v481_v2 = vld [vmem:[%s1084_s4 + $0x1e0] sm:$0x80]  ;;  %v482_v3 = vld [vmem:[%s1084_s4 + $0x1e8] sm:$0x80] }
  0x56   : > { %v251_v18 = vmin.f32 %v249_v59, %v250_v6  ;;  %v263_v19 = vmin.f32 %v261_v60, %v262_v7  ;;  %v361_v29 = vrot.slane %v360_v16, 4  ;;  %v374_v30 = vrot.slane %v373_v17, 4  ;;  %v339_v5 = vld [vmem:[%s1084_s4 + $0x1a8] sm:$0xff] }
  0x57   : > { %v279_v24 = vrot.slane %v270_v10, %v1135_v13  ;;  %v286_v25 = vrot.slane %v271_v11, %v1135_v13  ;;  %v381_v32 = vmin.f32 %v380_v23, %v324_v14  ;;  %v393_v34 = vsel %vm352_vm1, %v319_v12, inf  ;;  %v351_v10 = vld [vmem:[%s1084_s4 + $0x208] sm:$0x7f] }
  0x58   : > { %v272_v27 = vcombine.low %v251_v18, %v263_v19  ;;  %v362_v39 = vmin.f32 %v360_v16, %v361_v29  ;;  %v375_v40 = vmin.f32 %v373_v17, %v374_v30  ;;  %v394_v41 = vmin.f32 %v393_v34, %v325_v22  ;;  %v487_v16 = vld [vmem:[%s1084_s4 + $0x210] sm:$0xff]  ;;  %v345_v17 = vld [vmem:[%s1084_s4 + $0x1d8] sm:$0xff]  ;;  %v493_v29 = vld [vmem:[%s1084_s4 + $0x240] sm:$0xff] }
  0x59   : > { %v294_v35 = vcombine.low %v279_v24, %v286_v25  ;;  %v382_v45 = vmin.f32 %v381_v32, %v330_v26  ;;  %v398_v46 = vsel %vm358_vm2, %v349_v28, inf  ;;  %v406_v47 = vsel %vm352_vm1, %v320_v21, inf  ;;  %v488_v21 = vld [vmem:[%s1084_s4 + $0x218] sm:$0xff]  ;;  %v517_v30 = vld [vmem:[%s1084_s4 + $0x300] sm:$0x7] }
  0x5a   : > { %v293_v42 = vrot.slane %v272_v27, %v1135_v13  ;;  %v363_v52 = vrot.slane %v362_v39, 2  ;;  %v376_v53 = vrot.slane %v375_v40, 2  ;;  %v395_v54 = vmin.f32 %v394_v41, %v331_v31  ;;  %v518_v34 = vld [vmem:[%s1084_s4 + $0x308] sm:$0x7] }
  0x5b   : > { %v301_v48 = vrot.slane %v294_v35, %v1135_v13  ;;  %v383_v58 = vmin.f32 %v382_v45, %v336_v38  ;;  %v407_v59 = vmin.f32 %v406_v47, %v326_v37  ;;  %v419_v60 = vsel %vm352_vm1, %v321_v36, inf  ;;  %v483_v38 = vld [vmem:[%s1084_s4 + $0x1f0] sm:$0x80]  ;;  %v489_v45 = vld [vmem:[%s1084_s4 + $0x220] sm:$0xff] }
  0x5c   : > { %v308_v55 = vrot.slane %v293_v42, %v1135_v13  ;;  %v364_v62 = vmin.f32 %v362_v39, %v363_v52  ;;  %v377_v63 = vmin.f32 %v375_v40, %v376_v53  ;;  %v396_v0 = vmin.f32 %v395_v54, %v337_v44  ;;  %v499_v39 = vld [vmem:[%s1084_s4 + $0x270] sm:$0xff] }
  0x5d   : > { %v420_v1 = vmin.f32 %v419_v60, %v327_v43  ;;  %v384_v6 = vmin.f32 %v383_v58, %v342_v50  ;;  %v408_v7 = vmin.f32 %v407_v59, %v332_v49  ;;  %v411_v8 = vsel %vm358_vm2, %v350_v51, inf  ;;  %v505_v50 = vld [vmem:[%s1084_s4 + $0x2a0] sm:$0xff] }
  0x5e   : > { %v309_v4 = vcombine.low %v301_v48, %v308_v55  ;;  %v365_v11 = vrot.slane %v364_v62, 1  ;;  %v378_v12 = vrot.slane %v377_v63, 1  ;;  %v397_v14 = vmin.f32 %v396_v0, %v343_v57  ;;  %v495_v55 = vld [vmem:[%s1084_s4 + $0x250] sm:$0xff] }
  0x5f   : > { %v421_v15 = vmin.f32 %v420_v1, %v333_v56  ;;  %v386_v18 = vmin.f32 %v384_v6, %v385_v33  ;;  %v409_v19 = vmin.f32 %v408_v7, %v338_v61  ;;  %v524_v22 = vsel %vm523_vm3, %v481_v2, inf  ;;  %v494_v33 = vld [vmem:[%s1084_s4 + $0x248] sm:$0xff]  ;;  %v484_v61 = vld [vmem:[%s1084_s4 + $0x1f8] sm:$0x80] }
  0x60   : > { %315 = vst.msk [vmem:[%s1197_s25] ss:$4 sm:$0x3f] %vm1156_vm4, %v309_v4  ;;  %v539_v23 = vsel %vm523_vm3, %v482_v3, inf  ;;  %v366_v24 = vmin.f32 %v364_v62, %v365_v11  ;;  %v379_v25 = vmin.f32 %v377_v63, %v378_v12  ;;  %v399_v26 = vmin.f32 %v397_v14, %v398_v46  ;;  %v500_v46 = vld [vmem:[%s1084_s4 + $0x278] sm:$0xff]  ;;  %v506_v56 = vld [vmem:[%s1084_s4 + $0x2a8] sm:$0xff] }
  0x61   : > { %v422_v28 = vmin.f32 %v421_v15, %v339_v5  ;;  %v387_v27 = vrot.slane %v386_v18, 4  ;;  %v410_v31 = vmin.f32 %v409_v19, %v344_v9  ;;  %v424_v32 = vsel %vm358_vm2, %v351_v10, inf  ;;  %v511_v62 = vld [vmem:[%s1084_s4 + $0x2d0] sm:$0xff]  ;;  %v501_v4 = vld [vmem:[%s1084_s4 + $0x280] sm:$0xff]  ;;  %v512_v5 = vld [vmem:[%s1084_s4 + $0x2d8] sm:$0xff] }
  0x62   : > { %v525_v35 = vmin.f32 %v524_v22, %v487_v16  ;;  %v400_v36 = vrot.slane %v399_v26, 4  ;;  %v531_v40 = vsel %vm530_vm5, %v517_v30, inf  ;;  %v540_v41 = vmin.f32 %v539_v23, %v488_v21  ;;  %v490_v9 = vld [vmem:[%s1084_s4 + $0x228] sm:$0xff]  ;;  %v507_v15 = vld [vmem:[%s1084_s4 + $0x2b0] sm:$0xff]  ;;  %v496_v21 = vld [vmem:[%s1084_s4 + $0x258] sm:$0xff] }
  0x63   : > { %v423_v37 = vmin.f32 %v422_v28, %v345_v17  ;;  %v388_v42 = vmin.f32 %v386_v18, %v387_v27  ;;  %v412_v43 = vmin.f32 %v410_v31, %v411_v8  ;;  %v438_v44 = vcombine.low %v366_v24, %v379_v25  ;;  %v519_v22 = vld [vmem:[%s1084_s4 + $0x310] sm:$0x7]  ;;  %v513_v28 = vld [vmem:[%s1084_s4 + $0x2e0] sm:$0xff] }
  0x64   : > { %v526_v47 = vmin.f32 %v525_v35, %v493_v29  ;;  %v401_v48 = vmin.f32 %v399_v26, %v400_v36  ;;  %v541_v51 = vmin.f32 %v540_v41, %v494_v33  ;;  %v545_v52 = vsel %vm530_vm5, %v518_v34, inf  ;;  %v502_v33 = vld [vmem:[%s1084_s4 + $0x288] sm:$0xff] }
  0x65   : > { %v425_v49 = vmin.f32 %v423_v37, %v424_v32  ;;  %v389_v53 = vrot.slane %v388_v42, 2  ;;  %v413_v54 = vrot.slane %v412_v43, 4  ;;  %v553_v58 = vsel %vm523_vm3, %v483_v38, inf  ;;  %v485_v32 = vld [vmem:[%s1084_s4 + $0x200] sm:$0x80] }
  0x66   : > { %v527_v57 = vmin.f32 %v526_v47, %v499_v39  ;;  %v402_v59 = vrot.slane %v401_v48, 2  ;;  %v542_v63 = vmin.f32 %v541_v51, %v500_v46  ;;  %v554_v0 = vmin.f32 %v553_v58, %v489_v45 }
  0x67   : > { %v426_v60 = vrot.slane %v425_v49, 4  ;;  %v390_v1 = vmin.f32 %v388_v42, %v389_v53  ;;  %v414_v2 = vmin.f32 %v412_v43, %v413_v54  ;;  %v1224_v3 = vrot.slane %v438_v44, %v1135_v13  ;;  %v491_v43 = vld [vmem:[%s1084_s4 + $0x230] sm:$0xff]  ;;  %v520_v44 = vld [vmem:[%s1084_s4 + $0x318] sm:$0x7]  ;;  %v486_v53 = vld [vmem:[%s1084_s4 + $0x208] sm:$0x80] }
  0x68   : > { %v528_v6 = vmin.f32 %v527_v57, %v505_v50  ;;  %v403_v7 = vmin.f32 %v401_v48, %v402_v59  ;;  %v543_v10 = vmin.f32 %v542_v63, %v506_v56  ;;  %v555_v11 = vmin.f32 %v554_v0, %v495_v55  ;;  %v497_v54 = vld [vmem:[%s1084_s4 + $0x260] sm:$0xff]  ;;  %v514_v55 = vld [vmem:[%s1084_s4 + $0x2e8] sm:$0xff]  ;;  %v492_v0 = vld [vmem:[%s1084_s4 + $0x238] sm:$0xff] }
  0x69   : > { %v427_v8 = vmin.f32 %v425_v49, %v426_v60  ;;  %v391_v12 = vrot.slane %v390_v1, 1  ;;  %v415_v14 = vrot.slane %v414_v2, 2  ;;  %v567_v17 = vsel %vm523_vm3, %v484_v61, inf }
  0x6a   : > { %v529_v16 = vmin.f32 %v528_v6, %v511_v62  ;;  %v404_v18 = vrot.slane %v403_v7, 1  ;;  %v544_v23 = vmin.f32 %v543_v10, %v512_v5  ;;  %v556_v24 = vmin.f32 %v555_v11, %v501_v4  ;;  %v498_v10 = vld [vmem:[%s1084_s4 + $0x268] sm:$0xff]  ;;  %v509_v11 = vld [vmem:[%s1084_s4 + $0x2c0] sm:$0xff] }
  0x6b   : > { %v428_v19 = vrot.slane %v427_v8, 2  ;;  %v392_v25 = vmin.f32 %v390_v1, %v391_v12  ;;  %v416_v26 = vmin.f32 %v414_v2, %v415_v14  ;;  %v568_v30 = vmin.f32 %v567_v17, %v490_v9  ;;  %v503_v1 = vld [vmem:[%s1084_s4 + $0x290] sm:$0xff]  ;;  %v521_v14 = vld [vmem:[%s1084_s4 + $0x320] sm:$0x7] }
  0x6c   : > { %v532_v29 = vmin.f32 %v529_v16, %v531_v40  ;;  %v405_v27 = vmin.f32 %v403_v7, %v404_v18  ;;  %v546_v34 = vmin.f32 %v544_v23, %v545_v52  ;;  %v557_v35 = vmin.f32 %v556_v24, %v507_v15  ;;  %v508_v40 = vld [vmem:[%s1084_s4 + $0x2b8] sm:$0xff] }
  0x6d   : > { %v429_v31 = vmin.f32 %v427_v8, %v428_v19  ;;  %v417_v36 = vrot.slane %v416_v26, 1  ;;  %v559_v38 = vsel %vm530_vm5, %v519_v22, inf  ;;  %v569_v39 = vmin.f32 %v568_v30, %v496_v21  ;;  %v504_v18 = vld [vmem:[%s1084_s4 + $0x298] sm:$0xff]  ;;  %v515_v19 = vld [vmem:[%s1084_s4 + $0x2f0] sm:$0xff] }
  0x6e   : > { %v533_v37 = vrot.slane %v532_v29, 4  ;;  %v439_v42 = vcombine.low %v392_v25, %v405_v27  ;;  %v547_v45 = vrot.slane %v546_v34, 4  ;;  %v558_v46 = vmin.f32 %v557_v35, %v513_v28  ;;  %v516_v35 = vld [vmem:[%s1084_s4 + $0x2f8] sm:$0xff] }
  0x6f   : > { %v430_v41 = vrot.slane %v429_v31, 1  ;;  %v418_v47 = vmin.f32 %v416_v26, %v417_v36  ;;  %v570_v49 = vmin.f32 %v569_v39, %v502_v33  ;;  %v581_v50 = vsel %vm523_vm3, %v485_v32, inf }
  0x70   : > { %v534_v48 = vmin.f32 %v532_v29, %v533_v37  ;;  %v454_v52 = vrot.slane %v439_v42, %v1135_v13  ;;  %v548_v56 = vmin.f32 %v546_v34, %v547_v45  ;;  %v560_v57 = vmin.f32 %v558_v46, %v559_v38  ;;  %v510_v29 = vld [vmem:[%s1084_s4 + $0x2c8] sm:$0xff] }
  0x71   : > { %v431_v51 = vmin.f32 %v429_v31, %v430_v41  ;;  %v571_v59 = vmin.f32 %v570_v49, %v508_v40  ;;  %v573_v60 = vsel %vm530_vm5, %v520_v44, inf  ;;  %v582_v61 = vmin.f32 %v581_v50, %v491_v43  ;;  %v522_v31 = vld [vmem:[%s1084_s4 + $0x328] sm:$0x7] }
  0x72   : > { %v535_v58 = vrot.slane %v534_v48, 2  ;;  %v462_v63 = vcombine.low %v1224_v3, %v454_v52  ;;  %v549_v2 = vrot.slane %v548_v56, 2  ;;  %v561_v4 = vrot.slane %v560_v57, 4 }
  0x73   : > { %v440_v62 = vcombine.low %v418_v47, %v431_v51  ;;  %v572_v5 = vmin.f32 %v571_v59, %v514_v55  ;;  %v583_v6 = vmin.f32 %v582_v61, %v497_v54  ;;  %v595_v7 = vsel %vm523_vm3, %v486_v53, inf }
  0x74   : > { %v469_v9 = vrot.slane %v462_v63, %v1135_v13  ;;  %v562_v12 = vmin.f32 %v560_v57, %v561_v4  ;;  %v596_v16 = vmin.f32 %v595_v7, %v492_v0  ;;  %v536_v21 = vmin.f32 %v534_v48, %v535_v58 }
  0x75   : > { %v461_v8 = vrot.slane %v440_v62, %v1135_v13  ;;  %v574_v3 = vmin.f32 %v572_v5, %v573_v60  ;;  %v584_v15 = vmin.f32 %v583_v6, %v503_v1  ;;  %v550_v22 = vmin.f32 %v548_v56, %v549_v2 }
  0x76   : > { %v563_v23 = vrot.slane %v562_v12, 2  ;;  %v597_v26 = vmin.f32 %v596_v16, %v498_v10  ;;  %v587_v27 = vsel %vm530_vm5, %v521_v14, inf  ;;  %v537_v36 = vrot.slane %v536_v21, 1 }
  0x77   : > { %v476_v17 = vrot.slane %v461_v8, %v1135_v13  ;;  %v575_v24 = vrot.slane %v574_v3, 4  ;;  %v585_v25 = vmin.f32 %v584_v15, %v509_v11  ;;  %v551_v37 = vrot.slane %v550_v22, 1 }
  0x78   : > { %v564_v30 = vmin.f32 %v562_v12, %v563_v23  ;;  %v598_v34 = vmin.f32 %v597_v26, %v504_v18  ;;  %v601_v43 = vsel %vm530_vm5, %v522_v31, inf  ;;  %v538_v46 = vmin.f32 %v536_v21, %v537_v36 }
  0x79   : > { %v477_v28 = vcombine.low %v469_v9, %v476_v17  ;;  %v576_v32 = vmin.f32 %v574_v3, %v575_v24  ;;  %v586_v33 = vmin.f32 %v585_v25, %v515_v19  ;;  %v552_v47 = vmin.f32 %v550_v22, %v551_v37 }
  0x7a   : > { %v565_v38 = vrot.slane %v564_v30, 1  ;;  %v599_v42 = vmin.f32 %v598_v34, %v510_v29 }
  0x7b   : > { %765 = vst.msk [vmem:[%s1197_s25 + $0x1] ss:$4 sm:$0x3f] %vm1156_vm4, %v477_v28  ;;  %v577_v39 = vrot.slane %v576_v32, 2  ;;  %v588_v41 = vmin.f32 %v586_v33, %v587_v27  ;;  %v615_v57 = vcombine.low %v538_v46, %v552_v47 }
  0x7c   : > { %v600_v45 = vmin.f32 %v599_v42, %v516_v35  ;;  %v566_v48 = vmin.f32 %v564_v30, %v565_v38 }
  0x7d   : > { %v578_v40 = vmin.f32 %v576_v32, %v577_v39  ;;  %v589_v44 = vrot.slane %v588_v41, 4  ;;  %v624_v62 = vrot.slane %v615_v57, %v1135_v13 }
  0x7e   : > { %v602_v51 = vmin.f32 %v600_v45, %v601_v43 }
  0x7f   : > { %v579_v49 = vrot.slane %v578_v40, 1  ;;  %v590_v50 = vmin.f32 %v588_v41, %v589_v44 }
  0x80   : > { %v603_v54 = vrot.slane %v602_v51, 4 }
  0x81   : > { %v580_v52 = vmin.f32 %v578_v40, %v579_v49  ;;  %v591_v53 = vrot.slane %v590_v50, 2 }
  0x82   : > { %v604_v56 = vmin.f32 %v602_v51, %v603_v54 }
  0x83   : > { %v592_v55 = vmin.f32 %v590_v50, %v591_v53  ;;  %v616_v58 = vcombine.low %v566_v48, %v580_v52 }
  0x84   : > { %v605_v60 = vrot.slane %v604_v56, 2 }
  0x85   : > { %v593_v59 = vrot.slane %v592_v55, 1  ;;  %v631_v63 = vrot.slane %v616_v58, %v1135_v13 }
  0x86   : > { %v606_v61 = vmin.f32 %v604_v56, %v605_v60 }
  0x87   : > { %v594_v0 = vmin.f32 %v592_v55, %v593_v59  ;;  %v639_v4 = vcombine.low %v624_v62, %v631_v63 }
  0x88   : > { %v607_v1 = vrot.slane %v606_v61, 1 }
  0x89   : > { %v646_v7 = vrot.slane %v639_v4, %v1135_v13 }
  0x8a   : > { %v608_v2 = vmin.f32 %v606_v61, %v607_v1 }
  0x8c   : > { %v617_v5 = vcombine.low %v594_v0, %v608_v2 }
  0x8e   : > { %v638_v6 = vrot.slane %v617_v5, %v1135_v13 }
  0x90   : > { %v653_v8 = vrot.slane %v638_v6, %v1135_v13 }
  0x92   : > { %v654_v9 = vcombine.low %v646_v7, %v653_v8 }
  0x94   : > { %766 = vst.msk [vmem:[%s1197_s25 + $0x2] ss:$4 sm:$0x3f] %vm1156_vm4, %v654_v9 }
  0x95   : > { %883 = shalt.err (!%p880_p3)
}
  0x96   : > { %s884_s22 = scalar_lea.hbm %s1276_s12, 384  ;;  %s888_s26 = scalar_lea.hbm %s1328_s1, 1152 }
  0x97   : > { %p885_p5 = scmp.ne.s32.totalorder %s1276_s12, %s884_s22  ;;  %p889_p0 = scmp.lt.u32.totalorder %s1276_s12, %s1328_s1 }
  0x98   : > { %p890_p2 = scmp.lt.u32.totalorder %s888_s26, %s884_s22  ;;  %p892_p8 = scmp.lt.u32.totalorder %s884_s22, %s1276_s12 }
  0x99   : > { %p886_p6 = pnand %p885_p5, %p1338_p9 }
  0x9a   : > { %p891_p4 = por %p890_p2, %p889_p0 }
  0x9b   : > { %p887_p7 = pneg %p886_p6 }
  0x9c   : > { %p893_p11 = por %p892_p8, %p891_p4 }
  0x9e   : > { %p894_p13 = pnand %p893_p11, %p887_p7 }
  0xa0   : > { %897 = shalt.err (!%p894_p13)
}
  0xa1   : > { %777 = dma.vmem_to_hbm [thread:$0]  (%p1338_p9), %s1278_s30, 384, %s1276_s12, %s659_s13  }
  0xa2 PF: > { %p788_p10 = scmp.ge.s32.totalorder %s952_s11, 2  ;;  %s687_s3 = sand.u32 1, %s932_s6  }
  0xa3   : > { %p1339_p12 = scmp.ne.s32.totalorder %s1333_s21, 0  ;;  %s688_s4 = scalar_lea.sflag [#allocation4], %s687_s3 }
  0xa5   : > { %p784_p1 = pnand %p788_p10, %p1339_p12 }
  0xa7   : > { %927 = dma.done.wait (!%p784_p1), %s688_s4, 384  }
  0xa8   : > { %929 = vsyncadd (!%p784_p1), %s688_s4, 4294966912  ;;  %s17_s11 = sadd.s32 1, %s952_s11   ;;  %s1340_s6 = smov %s936_s7 }
  0xa9   : > { %p14_p3 = scmp.ge.s32.totalorder %s17_s11, 5   ;;  %s1341_s7 = smov %s940_s8 }
  0xaa   : > { %s1342_s8 = smov %s1025_s20  ;;  %s1343_s9 = smov %s948_s10 }
  0xab   : > { %s1344_s10 = smov %s1346_s14  ;;  %16 = sbr.rel (!%p14_p3) target bundleno = 6 (0x6), region = 71 }
  0xb2   :  { %693 = vsyncpa [#allocation3], 1 }
  0xb3   :  { %695 = vsyncpa [#allocation3 + $0x1], 1 }
  0xb4   :  { %696 = vsyncpa [#allocation4], 1 }
  0xb5   :  { %698 = vsyncpa [#allocation4 + $0x1], 1 }

</bundles_post_ra>
